<compile_context>
chip_gen: v5e
topology: v5e:2x2
jax: 0.10.0
libtpu: 0.0.40
codegen_flags: <defaults>
</compile_context>

<pallas_src>
import jax
import jax.numpy as jnp
from jax import lax
from jax.experimental import pallas as pl
from jax.experimental.pallas import tpu as pltpu


def _round_up(n, m):
    return ((n + m - 1) // m) * m


def _mlp_kernel(x_ref, w1t_ref, b1_ref, w2_ref, b2_ref, w3_ref, b3_ref, o_ref):
    # x_ref: (TB, 4) batch-major tile straight from HBM (no wrapper transpose/pad).
    x = x_ref[...]                                                      # (TB, 4)

    # fc1, batch on sublanes: (TB,4) @ (4,64) -> (TB,64); bias is a (1,64) row.
    h1 = jnp.dot(x, w1t_ref[...], preferred_element_type=jnp.float32)
    h1 = jnp.maximum(h1 + b1_ref[...], 0.0)

    # fc2 flips batch onto the lane axis via a transposed-RHS contraction:
    #   (64,64) x (TB,64) contracting last dims -> (64, TB) == (h1 @ W2^T)^T
    # (MXU handles the transposed operand; no explicit XLU transpose of the
    #  large tile, and the result is already feature-major for fc3.)
    h2t = lax.dot_general(
        w2_ref[...], h1, (((1,), (1,)), ((), ())),
        preferred_element_type=jnp.float32)                            # (64, TB)
    h2t = jnp.maximum(h2t + b2_ref[...], 0.0)                          # b2: (64,1)

    # fc3, batch on lanes: (1,64) @ (64,TB) -> (1,TB)  => lane-dense output store.
    o = jnp.dot(w3_ref[...], h2t, preferred_element_type=jnp.float32)
    o_ref[...] = o + b3_ref[...]                                       # b3: (1,1)


def mlp_forward(x, params, *, max_tb=8192):
    """x: (B, 4) float32 -> (B, 1) float32.  params in torch layout."""
    w1, b1, w2, b2, w3, b3 = params
    B = x.shape[0]

    # ---- batch tile selection -------------------------------------------
    # * B <= 128: single block whose dims equal the full array dims (always
    #   legal, no padding, no partial blocks).
    # * B  > 128: lane-dense multiple of 128, >= 2 grid steps so both v7x
    #   TensorCores get work, capped at max_tb to bound VMEM (~0.55 KiB/row).
    if B <= 128:
        tb = B
    else:
        tb = _round_up(pl.cdiv(B, 2), 128)
        tb = max(128, min(tb, max_tb))
    n_tiles = pl.cdiv(B, tb)

    # Tiny one-time layout fixes for the resident weights (a few KiB total —
    # negligible; the big x tensor is NOT touched in the wrapper anymore).
    w1t = w1.T                    # (4, 64)
    b1r = b1.reshape(1, 64)
    b2c = b2.reshape(64, 1)
    b3c = b3.reshape(1, 1)

    const = lambda i: (0, 0)

    flops = 2 * (4 * 64 + 64 * 64 + 64 * 1) * B
    bytes_accessed = 4 * (4 * B + B) + 4 * (64 * 4 + 64 + 64 * 64 + 64 + 64 + 1)

    out_t = pl.pallas_call(
        _mlp_kernel,
        out_shape=jax.ShapeDtypeStruct((1, B), jnp.float32),
        grid=(n_tiles,),
        in_specs=[
            pl.BlockSpec((tb, 4), lambda i: (i, 0)),     # x tile (pipelined)
            pl.BlockSpec((4, 64), const),                # W1^T (resident)
            pl.BlockSpec((1, 64), const),                # b1 row
            pl.BlockSpec((64, 64), const),               # W2 (torch layout)
            pl.BlockSpec((64, 1), const),                # b2 column
            pl.BlockSpec((1, 64), const),                # W3 (torch layout)
            pl.BlockSpec((1, 1), const),                 # b3
        ],
        out_specs=pl.BlockSpec((1, tb), lambda i: (0, i)),
        compiler_params=pltpu.CompilerParams(
            dimension_semantics=("parallel",),
            vmem_limit_bytes=32 * 1024 * 1024,
        ),
        cost_estimate=pl.CostEstimate(
            flops=flops, transcendentals=0, bytes_accessed=bytes_accessed),
    )(x, w1t, b1r, w2, b2c, w3, b3c)

    # (1, B) -> (B, 1): transpose of a (1,B) array is effectively a free reshape.
    return out_t.T


def init_params(key):
    """Parameters in torch layout: W (out_features, in_features), b (out_features,)."""
    k1, k2, k3, k4, k5, k6 = jax.random.split(key, 6)

    def uniform(k, shape, fan_in):
        bound = 1.0 / jnp.sqrt(jnp.float32(fan_in))
        return jax.random.uniform(k, shape, jnp.float32, -bound, bound)

    w1 = uniform(k1, (64, 4), 4)
    b1 = uniform(k2, (64,), 4)
    w2 = uniform(k3, (64, 64), 64)
    b2 = uniform(k4, (64,), 64)
    w3 = uniform(k5, (1, 64), 64)
    b3 = uniform(k6, (1,), 64)
    return (w1, b1, w2, b2, w3, b3)


def reference_forward(x, params):
    """Pure-JAX reference matching the PyTorch forward semantics."""
    w1, b1, w2, b2, w3, b3 = params
    h1 = jnp.maximum(x @ w1.T + b1, 0.0)
    h2 = jnp.maximum(h1 @ w2.T + b2, 0.0)
    return h2 @ w3.T + b3


if __name__ == "__main__":
    key = jax.random.PRNGKey(0)
    kx, kp = jax.random.split(key)

    params = init_params(kp)

    # Small single-block case.
    B = 8
    x = jax.random.normal(kx, (B, 4), dtype=jnp.float32)
    out = jax.block_until_ready(mlp_forward(x, params))
    ref = reference_forward(x, params)
    assert out.shape == (B, 1), out.shape
    assert jnp.allclose(out, ref, atol=1e-5, rtol=1e-5), "mismatch vs reference"

    # Multi-tile case with a ragged (partial) last batch tile.
    B2 = 300
    x2 = jax.random.normal(kx, (B2, 4), dtype=jnp.float32)
    out2 = jax.block_until_ready(mlp_forward(x2, params, max_tb=128))
    ref2 = reference_forward(x2, params)
    assert out2.shape == (B2, 1), out2.shape
    assert jnp.allclose(out2, ref2, atol=1e-5, rtol=1e-5), "mismatch vs reference (tiled)"

    print("KERNEL_OK")
</pallas_src>

<mosaic_0001>
module attributes {stable_mosaic.version = 11 : i64} {
  func.func @_mlp_kernel(%arg0: i32, %arg1: memref<8x4xf32, #tpu.memory_space<vmem>>, %arg2: memref<4x64xf32, #tpu.memory_space<vmem>>, %arg3: memref<1x64xf32, #tpu.memory_space<vmem>>, %arg4: memref<64x64xf32, #tpu.memory_space<vmem>>, %arg5: memref<64x1xf32, #tpu.memory_space<vmem>>, %arg6: memref<1x64xf32, #tpu.memory_space<vmem>>, %arg7: memref<1x1xf32, #tpu.memory_space<vmem>>, %arg8: memref<1x8xf32, #tpu.memory_space<vmem>>) attributes {dimension_semantics = [#tpu.dimension_semantics<parallel>], iteration_bounds = array<i64: 1>, scalar_prefetch = 0 : i64, scratch_operands = 0 : i64, tpu.core_type = #tpu.core_type<tc>, window_params = [{transform_indices = @transform_0, window_bounds = array<i64: 8, 4>}, {pipeline_mode = #tpu.pipeline_mode<synchronous>, transform_indices = @transform_1, window_bounds = array<i64: 4, 64>}, {pipeline_mode = #tpu.pipeline_mode<synchronous>, transform_indices = @transform_2, window_bounds = array<i64: 1, 64>}, {pipeline_mode = #tpu.pipeline_mode<synchronous>, transform_indices = @transform_3, window_bounds = array<i64: 64, 64>}, {pipeline_mode = #tpu.pipeline_mode<synchronous>, transform_indices = @transform_4, window_bounds = array<i64: 64, 1>}, {pipeline_mode = #tpu.pipeline_mode<synchronous>, transform_indices = @transform_5, window_bounds = array<i64: 1, 64>}, {pipeline_mode = #tpu.pipeline_mode<synchronous>, transform_indices = @transform_6, window_bounds = array<i64: 1, 1>}, {transform_indices = @transform_7, window_bounds = array<i64: 1, 8>}]} {
    %c0 = arith.constant 0 : index
    %c0_0 = arith.constant 0 : index
    %0 = vector.load %arg1[%c0, %c0_0] : memref<8x4xf32, #tpu.memory_space<vmem>>, vector<8x4xf32>
    %c0_1 = arith.constant 0 : index
    %c0_2 = arith.constant 0 : index
    %1 = vector.load %arg2[%c0_1, %c0_2] : memref<4x64xf32, #tpu.memory_space<vmem>>, vector<4x64xf32>
    %cst = arith.constant dense<0.000000e+00> : vector<8x64xf32>
    %2 = tpu.matmul %0, %1, %cst {dimension_numbers = #tpu.dot_dimension_numbers<[1], [0], [0], [1], [0, 0, 1, 1], [], []>} : vector<8x4xf32>, vector<4x64xf32>, vector<8x64xf32> -> vector<8x64xf32>
    %c0_3 = arith.constant 0 : index
    %c0_4 = arith.constant 0 : index
    %3 = vector.load %arg3[%c0_3, %c0_4] : memref<1x64xf32, #tpu.memory_space<vmem>>, vector<1x64xf32>
    %4 = vector.broadcast %3 : vector<1x64xf32> to vector<8x64xf32>
    %5 = arith.addf %2, %4 : vector<8x64xf32>
    %cst_5 = arith.constant 0.000000e+00 : f32
    %6 = vector.broadcast %cst_5 : f32 to vector<8x64xf32>
    %7 = arith.maximumf %5, %6 : vector<8x64xf32>
    %c0_6 = arith.constant 0 : index
    %c0_7 = arith.constant 0 : index
    %8 = vector.load %arg4[%c0_6, %c0_7] : memref<64x64xf32, #tpu.memory_space<vmem>>, vector<64x64xf32>
    %cst_8 = arith.constant dense<0.000000e+00> : vector<64x8xf32>
    %9 = tpu.matmul %8, %7, %cst_8 {dimension_numbers = #tpu.dot_dimension_numbers<[1], [1], [0], [0], [0, 0, 1, 0], [], []>} : vector<64x64xf32>, vector<8x64xf32>, vector<64x8xf32> -> vector<64x8xf32>
    %c0_9 = arith.constant 0 : index
    %c0_10 = arith.constant 0 : index
    %10 = vector.load %arg5[%c0_9, %c0_10] : memref<64x1xf32, #tpu.memory_space<vmem>>, vector<64x1xf32>
    %11 = vector.broadcast %10 : vector<64x1xf32> to vector<64x8xf32>
    %12 = arith.addf %9, %11 : vector<64x8xf32>
    %cst_11 = arith.constant 0.000000e+00 : f32
    %13 = vector.broadcast %cst_11 : f32 to vector<64x8xf32>
    %14 = arith.maximumf %12, %13 : vector<64x8xf32>
    %c0_12 = arith.constant 0 : index
    %c0_13 = arith.constant 0 : index
    %15 = vector.load %arg6[%c0_12, %c0_13] : memref<1x64xf32, #tpu.memory_space<vmem>>, vector<1x64xf32>
    %cst_14 = arith.constant dense<0.000000e+00> : vector<1x8xf32>
    %16 = tpu.matmul %15, %14, %cst_14 {dimension_numbers = #tpu.dot_dimension_numbers<[1], [0], [0], [1], [0, 0, 1, 1], [], []>} : vector<1x64xf32>, vector<64x8xf32>, vector<1x8xf32> -> vector<1x8xf32>
    %c0_15 = arith.constant 0 : index
    %c0_16 = arith.constant 0 : index
    %17 = vector.load %arg7[%c0_15, %c0_16] : memref<1x1xf32, #tpu.memory_space<vmem>>, vector<1x1xf32>
    %18 = vector.broadcast %17 : vector<1x1xf32> to vector<1x8xf32>
    %19 = arith.addf %16, %18 : vector<1x8xf32>
    %c0_17 = arith.constant 0 : index
    %c0_18 = arith.constant 0 : index
    %20 = vector.load %arg8[%c0_17, %c0_18] : memref<1x8xf32, #tpu.memory_space<vmem>>, vector<1x8xf32>
    tpu.vector_store %arg8[%c0_17, %c0_18], %19 {strides = array<i32>} : memref<1x8xf32, #tpu.memory_space<vmem>>, vector<1x8xf32>,
    return
  }
  func.func @transform_0(%arg0: i32) -> (i32, i32) {
    %c0_i32 = arith.constant 0 : i32
    %c0_i32_0 = arith.constant 0 : i32
    return %arg0, %c0_i32 : i32, i32
  }
  func.func @transform_1(%arg0: i32) -> (i32, i32) {
    %c0_i32 = arith.constant 0 : i32
    %c0_i32_0 = arith.constant 0 : i32
    %c0_i32_1 = arith.constant 0 : i32
    return %c0_i32, %c0_i32_0 : i32, i32
  }
  func.func @transform_2(%arg0: i32) -> (i32, i32) {
    %c0_i32 = arith.constant 0 : i32
    %c0_i32_0 = arith.constant 0 : i32
    %c0_i32_1 = arith.constant 0 : i32
    return %c0_i32, %c0_i32_0 : i32, i32
  }
  func.func @transform_3(%arg0: i32) -> (i32, i32) {
    %c0_i32 = arith.constant 0 : i32
    %c0_i32_0 = arith.constant 0 : i32
    %c0_i32_1 = arith.constant 0 : i32
    return %c0_i32, %c0_i32_0 : i32, i32
  }
  func.func @transform_4(%arg0: i32) -> (i32, i32) {
    %c0_i32 = arith.constant 0 : i32
    %c0_i32_0 = arith.constant 0 : i32
    %c0_i32_1 = arith.constant 0 : i32
    return %c0_i32, %c0_i32_0 : i32, i32
  }
  func.func @transform_5(%arg0: i32) -> (i32, i32) {
    %c0_i32 = arith.constant 0 : i32
    %c0_i32_0 = arith.constant 0 : i32
    %c0_i32_1 = arith.constant 0 : i32
    return %c0_i32, %c0_i32_0 : i32, i32
  }
  func.func @transform_6(%arg0: i32) -> (i32, i32) {
    %c0_i32 = arith.constant 0 : i32
    %c0_i32_0 = arith.constant 0 : i32
    %c0_i32_1 = arith.constant 0 : i32
    return %c0_i32, %c0_i32_0 : i32, i32
  }
  func.func @transform_7(%arg0: i32) -> (i32, i32) {
    %c0_i32 = arith.constant 0 : i32
    %c0_i32_0 = arith.constant 0 : i32
    return %c0_i32, %arg0 : i32, i32
  }
}

</mosaic_0001>

<bundles_post_ra>
// kernel: tpu_custom_call.1
= control target key start
LH: loop header
LB: loop body
LE: loop exit
PB: predicated region body
PF: predicated region fallthrough
CT: control target
= control target key end

     0   :  { %s412_s0 = inlined_call_operand.vmem [shape: f32[8,4], index: 0, kind: input, shape index: {}]   ;;  %s413_s1 = inlined_call_operand.vmem [shape: f32[4,64], index: 1, kind: input, shape index: {}]   ;;  %s414_s2 = inlined_call_operand.vmem [shape: f32[1,64], index: 2, kind: input, shape index: {}]   ;;  %s415_s3 = inlined_call_operand.vmem [shape: f32[64,64], index: 3, kind: input, shape index: {}]   ;;  %s416_s4 = inlined_call_operand.vmem [shape: f32[64,1], index: 4, kind: input, shape index: {}]   ;;  %s417_s5 = inlined_call_operand.vmem [shape: f32[1,64], index: 5, kind: input, shape index: {}]   ;;  %s418_s6 = inlined_call_operand.<no memory space> [shape: f32[1,1], index: 6, kind: input, shape index: {}]   ;;  %s419_s7 = inlined_call_operand.hbm [shape: f32[1,8], index: 7, kind: output, shape index: {}]  }
   0x1   :  { %v12_v0 = vstv %s418_s6 }
   0x2   :  { %13 = vst [vmem:[#allocation2] sm:$0x1] %v12_v0 }
   0x3   :  { %v30_v1 = vld [vmem:[%s413_s1] sm:$0xf]  ;;  %vm39_vm0 = vcmask 1043456   ;;  %vm35_vm1 = vcmask 31744  }
   0x4   :  { %v29_v2 = vld [vmem:[%s412_s0] sm:$0xff]  ;;  %246 = vmatpush.msk.msra.mxu0 %vm39_vm0, %v30_v1 }
   0x5   :  { %14 = vsyncpa [#allocation4], 0  ;;  %247 = vmatmul.msk.f32.vlgmr.msra.gmra.mxu0 %vm35_vm1, %v29_v2  ;;  %v79_v3 = vld [vmem:[%s416_s4 + $0x38] sm:$0xff]  ;;  %v77_v4 = vld [vmem:[%s416_s4 + $0x28] sm:$0xff]  ;;  %v292_v5 = vmov 0   ;;  %vm120_vm2 = vcmask 523264  }
   0x6   :  { %262 = vset.pattern.permute.xlu0 %v292_v5  ;;  %263 = vset.pattern.permute.xlu1 %v292_v5  ;;  %v78_v6 = vld [vmem:[%s416_s4 + $0x30] sm:$0xff]  ;;  %v76_v7 = vld [vmem:[%s416_s4 + $0x20] sm:$0xff]  ;;  %v75_v8 = vld [vmem:[%s416_s4 + $0x18] sm:$0xff]  ;;  %s293_s11 = smov [#allocation3]   ;;  %s237_s15 = sshll.u32 %s419_s7, 4  ;;  %vm228_vm3 = vcmask 57344   ;;  %s238_s15 = int_to_ptr.hbm [resolvable:$true] %s237_s15 }
   0x7   :  { %117 = vperm.xlu0 %262, %v79_v3   ;;  %107 = vperm.xlu1 %263, %v77_v4   ;;  %v265_v9 = vld [vmem:[%s414_s2] ss:$0 sm:$0xff]  ;;  %v73_v11 = vld [vmem:[%s416_s4 + $0x8] sm:$0xff]  ;;  %v74_v14 = vld [vmem:[%s416_s4 + $0x10] sm:$0xff]  ;;  %s235_s12 = sshll.u32 %s293_s11, 4  ;;  %s236_s12 = int_to_ptr.vmem [resolvable:$true] %s235_s12 }
   0x8   :  { %264 = vset.pattern.permute.xlu2 %v292_v5  ;;  %v72_v12 = vld [vmem:[%s416_s4] sm:$0xff]  ;;  %v66_v16 = vld [vmem:[%s415_s3 + $0x10] sm:$0xff]  ;;  %v69_v18 = vld [vmem:[%s415_s3 + $0x28] sm:$0xff] }
   0x9   :  { %97 = vperm.xlu2 %264, %v75_v8   ;;  %v64_v17 = vld [vmem:[%s415_s3] sm:$0xff]  ;;  %v67_v20 = vld [vmem:[%s415_s3 + $0x18] sm:$0xff]  ;;  %v65_v21 = vld [vmem:[%s415_s3 + $0x8] sm:$0xff] }
   0xa   :  { %v198_v19 = vld [vmem:[#allocation2] sm:$0x1]  ;;  %v70_v22 = vld [vmem:[%s415_s3 + $0x30] sm:$0xff]  ;;  %v71_v24 = vld [vmem:[%s415_s3 + $0x38] sm:$0xff] }
   0xb   :  { %v68_v23 = vld [vmem:[%s415_s3 + $0x20] sm:$0xff] }
   0xc   :  { %v197_v57 = vld [vmem:[%s417_s5] sm:$0x1] }
   0xf   :  { %112 = vperm.xlu0 %262, %v78_v6   ;;  %102 = vperm.xlu1 %263, %v76_v7  }
  0x11   :  { %92 = vperm.xlu2 %264, %v74_v14  }
  0x17   :  { %87 = vperm.xlu0 %262, %v73_v11   ;;  %82 = vperm.xlu1 %263, %v72_v12  }
  0x19   :  { %201 = vperm.xlu2 %264, %v198_v19  }
  0x63   :  { %v98_v31 = vpop.permute.xlu2 %97 }
  0x6b   :  { %v93_v43 = vpop.permute.xlu2 %92 }
  0x73   :  { %v202_v58 = vpop.permute.xlu2 %201 }
  0x74   :  { %v204_v59 = vperm.slane %v202_v58, 0 }
  0x79   :  { %v118_v27 = vpop.permute.xlu0 %117  ;;  %v108_v28 = vpop.permute.xlu1 %107 }
  0x81   :  { %v113_v32 = vpop.permute.xlu0 %112  ;;  %v103_v34 = vpop.permute.xlu1 %102 }
  0x82   :  { %v60_v10 = vpop.f32.mrf.mxu0 }
  0x83   :  { %v61_v13 = vadd.f32 %v265_v9, %v60_v10 }
  0x85   :  { %v63_v15 = vmax.f32 %v61_v13, 0.0 }
  0x87   :  { %248 = vmatpush.xpose.msk.msrb.mxu0 %vm120_vm2, %v63_v15  ;;  %258 = vmatpush.xpose.msk.msra.mxu1 %vm120_vm2, %v63_v15 }
  0x88   :  { %259 = vmatpush.xpose.msk.msra.mxu3 %vm120_vm2, %v63_v15 }
  0x89   :  { %v88_v46 = vpop.permute.xlu0 %87  ;;  %v83_v50 = vpop.permute.xlu1 %82 }
  0x8a   :  { %251 = vmatmul.msk.f32.vlgmr.msra.gmra.mxu1 %vm120_vm2, %v66_v16  ;;  %249 = vmatmul.msk.f32.vlgmr.msrb.gmra.mxu0 %vm120_vm2, %v64_v17 }
  0x8b   :  { %254 = vmatmul.msk.f32.vlgmr.msra.gmra.mxu3 %vm120_vm2, %v69_v18 }
  0x92   :  { %252 = vmatmul.msk.f32.gmra.mxu1 %vm120_vm2, %v67_v20  ;;  %250 = vmatmul.msk.f32.gmra.mxu0 %vm120_vm2, %v65_v21 }
  0x93   :  { %255 = vmatmul.msk.f32.gmra.mxu3 %vm120_vm2, %v70_v22 }
  0x9a   :  { %253 = vmatmul.msk.f32.gmra.mxu1 %vm120_vm2, %v68_v23 }
  0x9b   :  { %256 = vmatmul.msk.f32.gmra.mxu3 %vm120_vm2, %v71_v24 }
 0x107   :  { %v171_v25 = vpop.f32.mrf.mxu1  ;;  %v165_v33 = vpop.f32.mrf.mxu0 }
 0x108   :  { %v172_v48 = vadd.f32 %v171_v25, %v93_v43  ;;  %v166_v54 = vadd.f32 %v165_v33, %v83_v50 }
 0x10a   :  { %v191_v53 = vmax.f32 %v172_v48, 0.0  ;;  %v189_v56 = vmax.f32 %v166_v54, 0.0 }
 0x10e   :  { %v180_v26 = vpop.f32.mrf.mxu3 }
 0x10f   :  { %v174_v29 = vpop.f32.mrf.mxu1  ;;  %v181_v39 = vadd.f32 %v180_v26, %v108_v28  ;;  %v168_v47 = vpop.f32.mrf.mxu0 }
 0x110   :  { %v175_v45 = vadd.f32 %v174_v29, %v98_v31  ;;  %v169_v52 = vadd.f32 %v168_v47, %v88_v46 }
 0x111   :  { %v194_v44 = vmax.f32 %v181_v39, 0.0 }
 0x112   :  { %v192_v51 = vmax.f32 %v175_v45, 0.0  ;;  %v190_v55 = vmax.f32 %v169_v52, 0.0 }
 0x116   :  { %v183_v30 = vpop.f32.mrf.mxu3 }
 0x117   :  { %v184_v36 = vadd.f32 %v183_v30, %v113_v32  ;;  %v177_v38 = vpop.f32.mrf.mxu1 }
 0x118   :  { %v178_v42 = vadd.f32 %v177_v38, %v103_v34 }
 0x119   :  { %v195_v41 = vmax.f32 %v184_v36, 0.0 }
 0x11a   :  { %v193_v49 = vmax.f32 %v178_v42, 0.0 }
 0x11e   :  { %v186_v35 = vpop.f32.mrf.mxu3 }
 0x11f   :  { %v187_v37 = vadd.f32 %v186_v35, %v118_v27 }
 0x121   :  { %v196_v40 = vmax.f32 %v187_v37, 0.0 }
 0x123   :  { %216 = vmatpush.msra.mxu2 %v196_v40 }
 0x125   :  { %217 = vmatpush.msra.mxu2 %v195_v41 }
 0x127   :  { %218 = vmatpush.msra.mxu2 %v194_v44 }
 0x129   :  { %219 = vmatpush.msra.mxu2 %v193_v49 }
 0x12b   :  { %220 = vmatpush.msra.mxu2 %v192_v51 }
 0x12d   :  { %221 = vmatpush.msra.mxu2 %v191_v53 }
 0x12f   :  { %222 = vmatpush.msra.mxu2 %v190_v55 }
 0x131   :  { %223 = vmatpush.msra.mxu2 %v189_v56 }
 0x132   :  { %257 = vmatmul.msk.f32.vlgmr.msra.gmra.mxu2 %vm120_vm2, %v197_v57 }
 0x1b5   :  { %v225_v60 = vpop.f32.mrf.mxu2 }
 0x1b6   :  { %v226_v61 = vadd.f32 %v225_v60, %v204_v59 }
 0x1b8   :  { %229 = vst.msk [vmem:[#allocation3] sm:$0x1] %vm228_vm3, %v226_v61 }
 0x1b9   :  { %240 = dma.vmem_to_hbm [thread:$0]  %s236_s12, 16, %s238_s15, [#allocation4]  }
 0x1ba   :  { %290 = dma.done.wait [#allocation4], 16  }
 0x1bb   :  { %291 = vsyncadd [#allocation4], 4294967280 }
 0x1bc   :  { %245 = vsyncpa [#allocation4], 1 }

</bundles_post_ra>
